<compile_context>
chip_gen: v5e
topology: v5e:2x2
jax: 0.10.0
libtpu: 0.0.40
codegen_flags: <defaults>
</compile_context>

<pallas_src>
import functools

import jax
import jax.numpy as jnp
from jax.experimental import pallas as pl
from jax.experimental.pallas import tpu as pltpu


_VMEM_LIMIT_BYTES = 32 << 20      # explicit scoped-VMEM cap (safe on v5e/v6e/v7x)
_VMEM_BUDGET_BYTES = 24 << 20     # what the tile chooser may consume per step
_MAX_OUT_BLOCK_BYTES = 2 << 20    # target upper bound for one output block
_MIN_SPLIT_OUT_BYTES = 256 << 10  # only split for megacore if halves stay >= this


def _round_up(x, m):
    return (x + m - 1) // m * m


def _pick_tile_p(P, per_pixel_vmem_bytes, per_pixel_out_bytes):
    """Pick the pixel tile TP for the single ('parallel') grid axis."""
    if P % 128 != 0:
        # Full-extent last dim is always a legal block shape (14x14 maps etc.).
        return P
    cands = [t for t in range(128, P + 1, 128) if P % t == 0]
    ok = [t for t in cands
          if t * per_pixel_vmem_bytes <= _VMEM_BUDGET_BYTES
          and t * per_pixel_out_bytes <= _MAX_OUT_BLOCK_BYTES]
    tp = max(ok) if ok else 128
    # v7x megacore: prefer >=2 parallel steps, but only if each half output
    # block stays big enough that per-step overhead remains negligible.
    if tp == P:
        halves = [t for t in cands
                  if t <= P // 2 and t * per_pixel_out_bytes >= _MIN_SPLIT_OUT_BYTES]
        if halves:
            tp = max(halves)
    return tp


def _skipped_proj_kernel(x_ref, wa_ref, ba_ref, w2_ref, b2_ref, out_ref, *, c_mid):
    # x_ref: (N, C_in, TP) -- channels on sublanes, pixels on lanes.
    wa = wa_ref[...]          # (C_mid_p + C_out, C_in)   fused [W1 ; BN-folded Wfix]
    ba = ba_ref[...]          # (C_mid_p + C_out, 1)      f32
    w2 = w2_ref[...]          # (C_out, C_mid_p)
    b2 = b2_ref[...]          # (C_out, 1)                f32
    # Static unrolled loop over the (small) batch: 2-D MXU matmuls, no transposes.
    for n in range(x_ref.shape[0]):
        x = x_ref[n]                                                    # (C_in, TP)
        t = jnp.dot(wa, x, preferred_element_type=jnp.float32) + ba     # one MXU pass
        h = jnp.maximum(t[:c_mid, :], 0.0)        # inner hidden (C_mid_p, TP), aligned slice
        fix = t[c_mid:, :]                        # skip path    (C_out,  TP), aligned slice
        out = jnp.dot(w2, h, preferred_element_type=jnp.float32) + b2 + fix
        out_ref[n] = out.astype(out_ref.dtype)


def _skipped_id_kernel(x_ref, w1_ref, b1_ref, w2_ref, b2_ref, out_ref):
    # Identity skip: out = inner(x) + x
    w1 = w1_ref[...]; b1 = b1_ref[...]; w2 = w2_ref[...]; b2 = b2_ref[...]
    for n in range(x_ref.shape[0]):
        x = x_ref[n]                                                    # (C, TP)
        h = jnp.maximum(jnp.dot(w1, x, preferred_element_type=jnp.float32) + b1, 0.0)
        out = (jnp.dot(w2, h, preferred_element_type=jnp.float32)
               + b2 + x.astype(jnp.float32))
        out_ref[n] = out.astype(out_ref.dtype)


def prepare_skipped_params(inner_params, fix_params=None, *, eps=1e-5,
                           compute_dtype=jnp.float32):
    """Fold BatchNorm into the skip conv, fuse & pad weights. Do once at load time.

    inner_params = (w1 (C_mid,C_in), b1 (C_mid,), w2 (C_out,C_mid), b2 (C_out,))
    fix_params   = None -> Identity skip (requires C_out == C_in)
                 = (wf, bf, gamma, beta, mean, var) -> Conv1x1 + BatchNorm2d (inference)
    """
    w1, b1, w2, b2 = inner_params
    c_mid, c_in = w1.shape
    c_out = w2.shape[0]
    cdt = jnp.dtype(compute_dtype)
    sub = 16 if cdt == jnp.bfloat16 else 8       # sublane tile for the f32/bf16 split

    if fix_params is None:
        assert c_out == c_in, "Identity skip requires out_channels == in_channels"
        return dict(kind="identity",
                    w1=w1.astype(cdt),
                    b1=jnp.asarray(b1, jnp.float32).reshape(c_mid, 1),
                    w2=w2.astype(cdt),
                    b2=jnp.asarray(b2, jnp.float32).reshape(c_out, 1),
                    c_in=c_in, c_out=c_out)

    wf, bf, gamma, beta, mean, var = fix_params
    # Fold BatchNorm (inference) into the 1x1 projection conv.
    scale = gamma / jnp.sqrt(var + eps)
    wf_bn = (wf * scale[:, None]).astype(jnp.float32)
    bf_bn = (bf - mean) * scale + beta
    # Pad C_mid to a sublane-tile multiple so the in-kernel row split is a free view.
    c_mid_p = _round_up(c_mid, sub)
    pad = c_mid_p - c_mid
    w1p = jnp.pad(w1, ((0, pad), (0, 0)))
    b1p = jnp.pad(b1, (0, pad))
    w2p = jnp.pad(w2, ((0, 0), (0, pad)))
    # Fuse the two matmuls that share x: [W1 ; Wfix_bn] -> one MXU pass, slice rows.
    wa = jnp.concatenate([w1p, wf_bn], axis=0).astype(cdt)        # (C_mid_p + C_out, C_in)
    ba = jnp.concatenate([b1p, bf_bn], axis=0).astype(jnp.float32)[:, None]
    return dict(kind="proj",
                wa=wa, ba=ba,
                w2=w2p.astype(cdt),
                b2=jnp.asarray(b2, jnp.float32).reshape(c_out, 1),
                c_mid_p=c_mid_p, c_in=c_in, c_out=c_out)


def skipped_apply(params, x):
    """y = inner(x) + fix(x) for NCHW x, using pre-fused `params`."""
    N, C_in, H, W = x.shape
    assert C_in == params["c_in"]
    C_out = params["c_out"]
    P = H * W
    out_dtype = x.dtype
    in_item = jnp.dtype(x.dtype).itemsize
    out_item = jnp.dtype(out_dtype).itemsize

    x3 = x.reshape(N, C_in, P)                  # free reshape; channels-major kept

    if params["kind"] == "proj":
        weights = (params["wa"], params["ba"], params["w2"], params["b2"])
        c_mid_p = params["c_mid_p"]
        c_all = c_mid_p + C_out
        per_pixel_tmp = 4 * N * (c_all + c_mid_p + C_out)          # f32 t, h, out
        flops = 2 * N * P * (C_in * c_all + c_mid_p * C_out)
        kernel = functools.partial(_skipped_proj_kernel, c_mid=c_mid_p)
    else:
        weights = (params["w1"], params["b1"], params["w2"], params["b2"])
        c_mid = params["w1"].shape[0]
        per_pixel_tmp = 4 * N * (c_mid + C_out + C_in)             # f32 h, out, x
        flops = 2 * N * P * (C_in * c_mid + c_mid * C_out)
        kernel = _skipped_id_kernel

    # VMEM per pixel of TP: double-buffered x/out blocks + in-kernel f32 temporaries.
    per_pixel_vmem = N * (2 * C_in * in_item + 2 * C_out * out_item) + per_pixel_tmp
    per_pixel_out = N * C_out * out_item
    TP = _pick_tile_p(P, per_pixel_vmem, per_pixel_out)
    grid = (P // TP,)

    x_spec = pl.BlockSpec((N, C_in, TP), lambda p: (0, 0, p))
    o_spec = pl.BlockSpec((N, C_out, TP), lambda p: (0, 0, p))
    w_specs = [pl.BlockSpec(w.shape, lambda p: (0, 0)) for w in weights]

    bytes_accessed = (int(x3.size) * in_item
                      + sum(int(w.size) * jnp.dtype(w.dtype).itemsize for w in weights)
                      + N * C_out * P * out_item)

    out3 = pl.pallas_call(
        kernel,
        out_shape=jax.ShapeDtypeStruct((N, C_out, P), out_dtype),
        grid=grid,
        in_specs=[x_spec] + w_specs,
        out_specs=o_spec,
        compiler_params=pltpu.CompilerParams(
            dimension_semantics=("parallel",),
            vmem_limit_bytes=_VMEM_LIMIT_BYTES),
        cost_estimate=pl.CostEstimate(flops=flops, transcendentals=0,
                                      bytes_accessed=bytes_accessed),
    )(x3, *weights)
    return out3.reshape(N, C_out, H, W)


def skipped_forward(x, inner_params, fix_params=None, *, eps=1e-5):
    """Convenience wrapper: prepare (BN fold + fusion) then apply."""
    params = prepare_skipped_params(inner_params, fix_params, eps=eps,
                                    compute_dtype=x.dtype)
    return skipped_apply(params, x)


if __name__ == "__main__":
    key = jax.random.PRNGKey(0)
    ks = jax.random.split(key, 12)

    N, C_IN, C_MID, C_OUT, H, W = 2, 16, 32, 32, 16, 16
    EPS = 1e-5

    x = jax.random.normal(ks[0], (N, C_IN, H, W), dtype=jnp.float32)

    # inner: Conv1x1(C_in->C_mid) + ReLU + Conv1x1(C_mid->C_out)
    w1 = jax.random.normal(ks[1], (C_MID, C_IN), jnp.float32) * 0.1
    b1 = jax.random.normal(ks[2], (C_MID,), jnp.float32) * 0.1
    w2 = jax.random.normal(ks[3], (C_OUT, C_MID), jnp.float32) * 0.1
    b2 = jax.random.normal(ks[4], (C_OUT,), jnp.float32) * 0.1

    # fix (out_channels != in_channels): Conv1x1(C_in->C_out) + BatchNorm2d (inference)
    wf = jax.random.normal(ks[5], (C_OUT, C_IN), jnp.float32) * 0.1
    bf = jax.random.normal(ks[6], (C_OUT,), jnp.float32) * 0.1
    gamma = 1.0 + 0.1 * jax.random.normal(ks[7], (C_OUT,), jnp.float32)
    beta = 0.1 * jax.random.normal(ks[8], (C_OUT,), jnp.float32)
    mean = 0.1 * jax.random.normal(ks[9], (C_OUT,), jnp.float32)
    var = jnp.abs(jax.random.normal(ks[10], (C_OUT,), jnp.float32)) + 0.5

    # --- projection-skip case (C_out != C_in) ---------------------------------
    proj_params = prepare_skipped_params(
        (w1, b1, w2, b2), (wf, bf, gamma, beta, mean, var), eps=EPS)
    run_proj = jax.jit(lambda xx: skipped_apply(proj_params, xx))
    out = jax.block_until_ready(run_proj(x))

    # Pure-JAX reference (1x1 convs as channel matmuls, f32-exact).
    hi = jax.lax.Precision.HIGHEST
    xr = x.reshape(N, C_IN, H * W)
    h_ref = jnp.maximum(
        jnp.einsum("oc,ncp->nop", w1, xr, precision=hi) + b1[None, :, None], 0.0)
    inner_ref = jnp.einsum("om,nmp->nop", w2, h_ref, precision=hi) + b2[None, :, None]
    fix_lin = jnp.einsum("oc,ncp->nop", wf, xr, precision=hi) + bf[None, :, None]
    scale = gamma / jnp.sqrt(var + EPS)
    fix_ref = (fix_lin - mean[None, :, None]) * scale[None, :, None] + beta[None, :, None]
    ref = (inner_ref + fix_ref).reshape(N, C_OUT, H, W)

    assert out.shape == (N, C_OUT, H, W)
    assert out.dtype == x.dtype
    assert jnp.allclose(out, ref, atol=2e-4, rtol=2e-4), \
        float(jnp.max(jnp.abs(out - ref)))

    # --- identity-skip case (C_out == C_in -> fix = Identity()) ---------------
    w1i = jax.random.normal(ks[11], (C_MID, C_IN), jnp.float32) * 0.1
    w2i = jax.random.normal(ks[4], (C_IN, C_MID), jnp.float32) * 0.1
    id_params = prepare_skipped_params((w1i, b1, w2i, b2[:C_IN]), None)
    run_id = jax.jit(lambda xx: skipped_apply(id_params, xx))
    out_id = jax.block_until_ready(run_id(x))

    h2 = jnp.maximum(
        jnp.einsum("oc,ncp->nop", w1i, xr, precision=hi) + b1[None, :, None], 0.0)
    ref_id = (jnp.einsum("om,nmp->nop", w2i, h2, precision=hi)
              + b2[:C_IN][None, :, None] + xr).reshape(N, C_IN, H, W)
    assert jnp.allclose(out_id, ref_id, atol=2e-4, rtol=2e-4), \
        float(jnp.max(jnp.abs(out_id - ref_id)))

    # --- bf16 storage path (halves HBM traffic; f32 accumulation) -------------
    xb = x.astype(jnp.bfloat16)
    proj_bf16 = prepare_skipped_params(
        (w1, b1, w2, b2), (wf, bf, gamma, beta, mean, var),
        eps=EPS, compute_dtype=jnp.bfloat16)
    out_bf16 = jax.block_until_ready(skipped_apply(proj_bf16, xb))
    assert out_bf16.dtype == jnp.bfloat16
    assert jnp.allclose(out_bf16.astype(jnp.float32), ref, atol=5e-2, rtol=5e-2)

    print("KERNEL_OK")
</pallas_src>

<mosaic_0001>
module attributes {stable_mosaic.version = 11 : i64} {
  func.func @_skipped_proj_kernel(%arg0: i32, %arg1: memref<2x16x256xf32, #tpu.memory_space<vmem>>, %arg2: memref<64x16xf32, #tpu.memory_space<vmem>>, %arg3: memref<64x1xf32, #tpu.memory_space<vmem>>, %arg4: memref<32x32xf32, #tpu.memory_space<vmem>>, %arg5: memref<32x1xf32, #tpu.memory_space<vmem>>, %arg6: memref<2x32x256xf32, #tpu.memory_space<vmem>>) attributes {dimension_semantics = [#tpu.dimension_semantics<parallel>], iteration_bounds = array<i64: 1>, scalar_prefetch = 0 : i64, scratch_operands = 0 : i64, tpu.core_type = #tpu.core_type<tc>, window_params = [{transform_indices = @transform_0, window_bounds = array<i64: 2, 16, 256>}, {pipeline_mode = #tpu.pipeline_mode<synchronous>, transform_indices = @transform_1, window_bounds = array<i64: 64, 16>}, {pipeline_mode = #tpu.pipeline_mode<synchronous>, transform_indices = @transform_2, window_bounds = array<i64: 64, 1>}, {pipeline_mode = #tpu.pipeline_mode<synchronous>, transform_indices = @transform_3, window_bounds = array<i64: 32, 32>}, {pipeline_mode = #tpu.pipeline_mode<synchronous>, transform_indices = @transform_4, window_bounds = array<i64: 32, 1>}, {transform_indices = @transform_5, window_bounds = array<i64: 2, 32, 256>}]} {
    %c0 = arith.constant 0 : index
    %c0_0 = arith.constant 0 : index
    %0 = vector.load %arg2[%c0, %c0_0] : memref<64x16xf32, #tpu.memory_space<vmem>>, vector<64x16xf32>
    %c0_1 = arith.constant 0 : index
    %c0_2 = arith.constant 0 : index
    %1 = vector.load %arg3[%c0_1, %c0_2] : memref<64x1xf32, #tpu.memory_space<vmem>>, vector<64x1xf32>
    %c0_3 = arith.constant 0 : index
    %c0_4 = arith.constant 0 : index
    %2 = vector.load %arg4[%c0_3, %c0_4] : memref<32x32xf32, #tpu.memory_space<vmem>>, vector<32x32xf32>
    %c0_5 = arith.constant 0 : index
    %c0_6 = arith.constant 0 : index
    %3 = vector.load %arg5[%c0_5, %c0_6] : memref<32x1xf32, #tpu.memory_space<vmem>>, vector<32x1xf32>
    %c0_7 = arith.constant 0 : index
    %c0_8 = arith.constant 0 : index
    %c0_9 = arith.constant 0 : index
    %4 = vector.load %arg1[%c0_7, %c0_8, %c0_9] : memref<2x16x256xf32, #tpu.memory_space<vmem>>, vector<1x16x256xf32>
    %5 = vector.shape_cast %4 : vector<1x16x256xf32> to vector<16x256xf32>
    %cst = arith.constant dense<0.000000e+00> : vector<64x256xf32>
    %6 = tpu.matmul %0, %5, %cst {dimension_numbers = #tpu.dot_dimension_numbers<[1], [0], [0], [1], [0, 0, 1, 1], [], []>} : vector<64x16xf32>, vector<16x256xf32>, vector<64x256xf32> -> vector<64x256xf32>
    %7 = vector.broadcast %1 : vector<64x1xf32> to vector<64x256xf32>
    %8 = arith.addf %6, %7 : vector<64x256xf32>
    %9 = vector.extract_strided_slice %8 {offsets = [0, 0], sizes = [32, 256], strides = [1, 1]} : vector<64x256xf32> to vector<32x256xf32>
    %cst_10 = arith.constant 0.000000e+00 : f32
    %10 = vector.broadcast %cst_10 : f32 to vector<32x256xf32>
    %11 = arith.maximumf %9, %10 : vector<32x256xf32>
    %12 = vector.extract_strided_slice %8 {offsets = [32, 0], sizes = [32, 256], strides = [1, 1]} : vector<64x256xf32> to vector<32x256xf32>
    %cst_11 = arith.constant dense<0.000000e+00> : vector<32x256xf32>
    %13 = tpu.matmul %2, %11, %cst_11 {dimension_numbers = #tpu.dot_dimension_numbers<[1], [0], [0], [1], [0, 0, 1, 1], [], []>} : vector<32x32xf32>, vector<32x256xf32>, vector<32x256xf32> -> vector<32x256xf32>
    %14 = vector.broadcast %3 : vector<32x1xf32> to vector<32x256xf32>
    %15 = arith.addf %13, %14 : vector<32x256xf32>
    %16 = arith.addf %15, %12 : vector<32x256xf32>
    %c0_12 = arith.constant 0 : index
    %c0_13 = arith.constant 0 : index
    %c0_14 = arith.constant 0 : index
    %17 = vector.load %arg6[%c0_12, %c0_13, %c0_14] : memref<2x32x256xf32, #tpu.memory_space<vmem>>, vector<1x32x256xf32>
    %18 = vector.shape_cast %17 : vector<1x32x256xf32> to vector<32x256xf32>
    %19 = vector.shape_cast %16 : vector<32x256xf32> to vector<1x32x256xf32>
    tpu.vector_store %arg6[%c0_12, %c0_13, %c0_14], %19 {strides = array<i32>} : memref<2x32x256xf32, #tpu.memory_space<vmem>>, vector<1x32x256xf32>,
    %c1 = arith.constant 1 : index
    %c0_15 = arith.constant 0 : index
    %c0_16 = arith.constant 0 : index
    %20 = vector.load %arg1[%c1, %c0_15, %c0_16] : memref<2x16x256xf32, #tpu.memory_space<vmem>>, vector<1x16x256xf32>
    %21 = vector.shape_cast %20 : vector<1x16x256xf32> to vector<16x256xf32>
    %cst_17 = arith.constant dense<0.000000e+00> : vector<64x256xf32>
    %22 = tpu.matmul %0, %21, %cst_17 {dimension_numbers = #tpu.dot_dimension_numbers<[1], [0], [0], [1], [0, 0, 1, 1], [], []>} : vector<64x16xf32>, vector<16x256xf32>, vector<64x256xf32> -> vector<64x256xf32>
    %23 = vector.broadcast %1 : vector<64x1xf32> to vector<64x256xf32>
    %24 = arith.addf %22, %23 : vector<64x256xf32>
    %25 = vector.extract_strided_slice %24 {offsets = [0, 0], sizes = [32, 256], strides = [1, 1]} : vector<64x256xf32> to vector<32x256xf32>
    %cst_18 = arith.constant 0.000000e+00 : f32
    %26 = vector.broadcast %cst_18 : f32 to vector<32x256xf32>
    %27 = arith.maximumf %25, %26 : vector<32x256xf32>
    %28 = vector.extract_strided_slice %24 {offsets = [32, 0], sizes = [32, 256], strides = [1, 1]} : vector<64x256xf32> to vector<32x256xf32>
    %cst_19 = arith.constant dense<0.000000e+00> : vector<32x256xf32>
    %29 = tpu.matmul %2, %27, %cst_19 {dimension_numbers = #tpu.dot_dimension_numbers<[1], [0], [0], [1], [0, 0, 1, 1], [], []>} : vector<32x32xf32>, vector<32x256xf32>, vector<32x256xf32> -> vector<32x256xf32>
    %30 = vector.broadcast %3 : vector<32x1xf32> to vector<32x256xf32>
    %31 = arith.addf %29, %30 : vector<32x256xf32>
    %32 = arith.addf %31, %28 : vector<32x256xf32>
    %c1_20 = arith.constant 1 : index
    %c0_21 = arith.constant 0 : index
    %c0_22 = arith.constant 0 : index
    %33 = vector.load %arg6[%c1_20, %c0_21, %c0_22] : memref<2x32x256xf32, #tpu.memory_space<vmem>>, vector<1x32x256xf32>
    %34 = vector.shape_cast %33 : vector<1x32x256xf32> to vector<32x256xf32>
    %35 = vector.shape_cast %32 : vector<32x256xf32> to vector<1x32x256xf32>
    tpu.vector_store %arg6[%c1_20, %c0_21, %c0_22], %35 {strides = array<i32>} : memref<2x32x256xf32, #tpu.memory_space<vmem>>, vector<1x32x256xf32>,
    return
  }
  func.func @transform_0(%arg0: i32) -> (i32, i32, i32) {
    %c0_i32 = arith.constant 0 : i32
    %c0_i32_0 = arith.constant 0 : i32
    %c0_i32_1 = arith.constant 0 : i32
    return %c0_i32, %c0_i32_0, %arg0 : i32, i32, i32
  }
  func.func @transform_1(%arg0: i32) -> (i32, i32) {
    %c0_i32 = arith.constant 0 : i32
    %c0_i32_0 = arith.constant 0 : i32
    %c0_i32_1 = arith.constant 0 : i32
    return %c0_i32, %c0_i32_0 : i32, i32
  }
  func.func @transform_2(%arg0: i32) -> (i32, i32) {
    %c0_i32 = arith.constant 0 : i32
    %c0_i32_0 = arith.constant 0 : i32
    %c0_i32_1 = arith.constant 0 : i32
    return %c0_i32, %c0_i32_0 : i32, i32
  }
  func.func @transform_3(%arg0: i32) -> (i32, i32) {
    %c0_i32 = arith.constant 0 : i32
    %c0_i32_0 = arith.constant 0 : i32
    %c0_i32_1 = arith.constant 0 : i32
    return %c0_i32, %c0_i32_0 : i32, i32
  }
  func.func @transform_4(%arg0: i32) -> (i32, i32) {
    %c0_i32 = arith.constant 0 : i32
    %c0_i32_0 = arith.constant 0 : i32
    %c0_i32_1 = arith.constant 0 : i32
    return %c0_i32, %c0_i32_0 : i32, i32
  }
  func.func @transform_5(%arg0: i32) -> (i32, i32, i32) {
    %c0_i32 = arith.constant 0 : i32
    %c0_i32_0 = arith.constant 0 : i32
    %c0_i32_1 = arith.constant 0 : i32
    return %c0_i32, %c0_i32_0, %arg0 : i32, i32, i32
  }
}

</mosaic_0001>

<bundles_post_ra>
// kernel: _lambda_.1
= control target key start
LH: loop header
LB: loop body
LE: loop exit
PB: predicated region body
PF: predicated region fallthrough
CT: control target
= control target key end

     0   :  { %v548_v3 = vmov 0   ;;  %vm88_vm0 = vcmask 130048   ;;  %vm223_vm1 = vcmask 261120   ;;  %s915_s0 = inlined_call_operand.vmem [shape: f32[2,16,256], index: 0, kind: input, shape index: {}]   ;;  %s916_s1 = inlined_call_operand.vmem [shape: f32[64,16], index: 1, kind: input, shape index: {}]   ;;  %s917_s2 = inlined_call_operand.vmem [shape: f32[64,1], index: 2, kind: input, shape index: {}]   ;;  %s918_s4 = inlined_call_operand.vmem [shape: f32[32,1], index: 4, kind: input, shape index: {}]   ;;  %s919_s3 = inlined_call_operand.vmem [shape: f32[32,32], index: 3, kind: input, shape index: {}]   ;;  %s920_s5 = inlined_call_operand.vmem [shape: f32[2,32,256], index: 5, kind: output, shape index: {}]  }
   0x1   :  { %v46_v0 = vld [vmem:[%s915_s0 + $0x10] sm:$0xff]  ;;  %v47_v1 = vld [vmem:[%s915_s0 + $0x18] sm:$0xff]  ;;  %v44_v2 = vld [vmem:[%s915_s0] sm:$0xff]  ;;  %546 = vset.pattern.permute.xlu1 %v548_v3  ;;  %545 = vset.pattern.permute.xlu0 %v548_v3 }
   0x2   :  { %127 = vmatpush.msra.mxu0 %v46_v0  ;;  %168 = vmatpush.msra.mxu1 %v47_v1  ;;  %v45_v4 = vld [vmem:[%s915_s0 + $0x8] sm:$0xff]  ;;  %v594_v5 = vld [vmem:[%s916_s1] sm:$0xff]  ;;  %v31_v7 = vld [vmem:[%s917_s2 + $0x18] sm:$0xff] }
   0x3   :  { %v29_v6 = vld [vmem:[%s917_s2 + $0x8] sm:$0xff]  ;;  %547 = vset.pattern.permute.xlu2 %v548_v3  ;;  %65 = vperm.xlu0 %545, %v31_v7   ;;  %v28_v8 = vld [vmem:[%s917_s2] sm:$0xff]  ;;  %v30_v10 = vld [vmem:[%s917_s2 + $0x10] sm:$0xff] }
   0x4   :  { %55 = vperm.xlu1 %546, %v29_v6   ;;  %128 = vmatpush.msra.mxu0 %v44_v2  ;;  %v612_v9 = vld [vmem:[%s916_s1 + $0x8] sm:$0xff]  ;;  %v35_v11 = vld [vmem:[%s917_s2 + $0x38] sm:$0xff]  ;;  %v627_v12 = vld [vmem:[%s916_s1 + $0x10] sm:$0xff] }
   0x5   :  { %169 = vmatpush.msra.mxu1 %v45_v4  ;;  %484 = vmatmul.msk.f32.vlgmr.msra.gmra.mxu0 %vm88_vm0, %v594_v5  ;;  %v34_v13 = vld [vmem:[%s917_s2 + $0x30] sm:$0xff]  ;;  %v642_v15 = vld [vmem:[%s916_s1 + $0x18] sm:$0xff]  ;;  %v41_v16 = vld [vmem:[%s918_s4 + $0x8] sm:$0xff] }
   0x6   :  { %492 = vmatmul.msk.f32.vlgmr.msra.gmra.mxu1 %vm88_vm0, %v594_v5  ;;  %v42_v14 = vld [vmem:[%s918_s4 + $0x10] sm:$0xff]  ;;  %v654_v17 = vld [vmem:[%s916_s1 + $0x20] sm:$0xff]  ;;  %v663_v18 = vld [vmem:[%s916_s1 + $0x28] sm:$0xff] }
   0x7   :  { %v672_v19 = vld [vmem:[%s916_s1 + $0x30] sm:$0xff]  ;;  %v681_v20 = vld [vmem:[%s916_s1 + $0x38] sm:$0xff]  ;;  %v32_v41 = vld [vmem:[%s917_s2 + $0x20] sm:$0xff] }
   0x8   :  { %70 = vperm.xlu2 %547, %v32_v41   ;;  %v709_v50 = vld [vmem:[%s919_s3] sm:$0xff]  ;;  %v510_v51 = vld [vmem:[%s915_s0 + $0x30] sm:$0xff]  ;;  %v511_v52 = vld [vmem:[%s915_s0 + $0x38] sm:$0xff] }
   0x9   :  { %v508_v53 = vld [vmem:[%s915_s0 + $0x20] sm:$0xff]  ;;  %v509_v54 = vld [vmem:[%s915_s0 + $0x28] sm:$0xff]  ;;  %v745_v58 = vld [vmem:[%s919_s3 + $0x10] sm:$0xff] }
   0xa   :  { %v33_v55 = vld [vmem:[%s917_s2 + $0x28] sm:$0xff]  ;;  %v40_v57 = vld [vmem:[%s918_s4] sm:$0xff]  ;;  %v754_v59 = vld [vmem:[%s919_s3 + $0x18] sm:$0xff] }
   0xb   :  { %60 = vperm.xlu0 %545, %v30_v10   ;;  %v733_v56 = vld [vmem:[%s919_s3 + $0x8] sm:$0xff]  ;;  %v43_v60 = vld [vmem:[%s918_s4 + $0x18] sm:$0xff] }
   0xc   :  { %50 = vperm.xlu1 %546, %v28_v8  }
   0xd   :  { %485 = vmatmul.msk.f32.gmra.mxu0 %vm88_vm0, %v612_v9 }
   0xe   :  { %493 = vmatmul.msk.f32.gmra.mxu1 %vm88_vm0, %v612_v9 }
  0x10   :  { %75 = vperm.xlu2 %547, %v33_v55  }
  0x13   :  { %80 = vperm.xlu0 %545, %v34_v13  }
  0x14   :  { %85 = vperm.xlu1 %546, %v35_v11  }
  0x15   :  { %486 = vmatmul.msk.f32.gmra.mxu0 %vm88_vm0, %v627_v12 }
  0x16   :  { %494 = vmatmul.msk.f32.gmra.mxu1 %vm88_vm0, %v627_v12 }
  0x18   :  { %205 = vperm.xlu2 %547, %v40_v57  }
  0x1b   :  { %210 = vperm.xlu0 %545, %v41_v16  }
  0x1c   :  { %215 = vperm.xlu1 %546, %v42_v14  }
  0x1d   :  { %487 = vmatmul.msk.f32.gmra.mxu0 %vm88_vm0, %v642_v15 }
  0x1e   :  { %495 = vmatmul.msk.f32.gmra.mxu1 %vm88_vm0, %v642_v15 }
  0x20   :  { %220 = vperm.xlu2 %547, %v43_v60  }
  0x25   :  { %488 = vmatmul.msk.f32.gmra.mxu0 %vm88_vm0, %v654_v17 }
  0x26   :  { %496 = vmatmul.msk.f32.gmra.mxu1 %vm88_vm0, %v654_v17 }
  0x2d   :  { %489 = vmatmul.msk.f32.gmra.mxu0 %vm88_vm0, %v663_v18 }
  0x2e   :  { %497 = vmatmul.msk.f32.gmra.mxu1 %vm88_vm0, %v663_v18 }
  0x35   :  { %490 = vmatmul.msk.f32.gmra.mxu0 %vm88_vm0, %v672_v19 }
  0x36   :  { %498 = vmatmul.msk.f32.gmra.mxu1 %vm88_vm0, %v672_v19 }
  0x3d   :  { %491 = vmatmul.msk.f32.gmra.mxu0 %vm88_vm0, %v681_v20 }
  0x3e   :  { %499 = vmatmul.msk.f32.gmra.mxu1 %vm88_vm0, %v681_v20 }
  0x62   :  { %v795_v61 = vpop.permute.xlu2 %70 }
  0x6a   :  { %v797_v62 = vpop.permute.xlu2 %75 }
  0x72   :  { %v801_v2 = vpop.permute.xlu2 %205 }
  0x75   :  { %v687_v25 = vpop.permute.xlu0 %65 }
  0x76   :  { %v689_v26 = vpop.permute.xlu1 %55 }
  0x7d   :  { %v691_v29 = vpop.permute.xlu0 %60 }
  0x7e   :  { %v697_v36 = vpop.permute.xlu1 %50 }
  0x82   :  { %v130_v21 = vpop.f32.mrf.mxu0 }
  0x83   :  { %v171_v22 = vpop.f32.mrf.mxu1  ;;  %v131_v42 = vadd.f32 %v130_v21, %v697_v36 }
  0x84   :  { %v172_v43 = vadd.f32 %v171_v22, %v697_v36 }
  0x85   :  { %v195_v48 = vmax.f32 %v131_v42, 0.0  ;;  %v799_v1 = vpop.permute.xlu0 %80 }
  0x86   :  { %v196_v49 = vmax.f32 %v172_v43, 0.0  ;;  %v807_v13 = vpop.permute.xlu1 %85 }
  0x8a   :  { %v133_v23 = vpop.f32.mrf.mxu0 }
  0x8b   :  { %v174_v24 = vpop.f32.mrf.mxu1  ;;  %v134_v37 = vadd.f32 %v133_v23, %v689_v26 }
  0x8c   :  { %v175_v38 = vadd.f32 %v174_v24, %v689_v26 }
  0x8d   :  { %v197_v46 = vmax.f32 %v134_v37, 0.0  ;;  %v815_v14 = vpop.permute.xlu0 %210 }
  0x8e   :  { %v198_v47 = vmax.f32 %v175_v38, 0.0 }
  0x92   :  { %v136_v27 = vpop.f32.mrf.mxu0 }
  0x93   :  { %v177_v28 = vpop.f32.mrf.mxu1  ;;  %v137_v32 = vadd.f32 %v136_v27, %v691_v29  ;;  %v827_v27 = vpop.permute.xlu1 %215 }
  0x94   :  { %v178_v33 = vadd.f32 %v177_v28, %v691_v29 }
  0x95   :  { %v199_v44 = vmax.f32 %v137_v32, 0.0 }
  0x96   :  { %v200_v45 = vmax.f32 %v178_v33, 0.0 }
  0x9a   :  { %v139_v30 = vpop.f32.mrf.mxu0 }
  0x9b   :  { %v180_v31 = vpop.f32.mrf.mxu1  ;;  %v140_v34 = vadd.f32 %v139_v30, %v687_v25 }
  0x9c   :  { %v181_v35 = vadd.f32 %v180_v31, %v687_v25 }
  0x9d   :  { %v201_v39 = vmax.f32 %v140_v34, 0.0 }
  0x9e   :  { %v202_v40 = vmax.f32 %v181_v35, 0.0 }
  0x9f   :  { %248 = vmatpush.msra.mxu2 %v201_v39 }
  0xa0   :  { %277 = vmatpush.msra.mxu3 %v202_v40  ;;  %v839_v40 = vpop.permute.xlu2 %220 }
  0xa1   :  { %249 = vmatpush.msra.mxu2 %v199_v44 }
  0xa2   :  { %278 = vmatpush.msra.mxu3 %v200_v45  ;;  %v142_v63 = vpop.f32.mrf.mxu0 }
  0xa3   :  { %250 = vmatpush.msra.mxu2 %v197_v46  ;;  %v183_v0 = vpop.f32.mrf.mxu1  ;;  %v143_v3 = vadd.f32 %v142_v63, %v795_v61 }
  0xa4   :  { %279 = vmatpush.msra.mxu3 %v198_v47  ;;  %v184_v4 = vadd.f32 %v183_v0, %v795_v61 }
  0xa5   :  { %251 = vmatpush.msra.mxu2 %v195_v48 }
  0xa6   :  { %280 = vmatpush.msra.mxu3 %v196_v49  ;;  %500 = vmatmul.msk.f32.vlgmr.msra.gmra.mxu2 %vm223_vm1, %v709_v50 }
  0xa7   :  { %504 = vmatmul.msk.f32.vlgmr.msra.gmra.mxu3 %vm223_vm1, %v709_v50  ;;  %329 = vmatpush.msrb.mxu2 %v510_v51 }
  0xa8   :  { %370 = vmatpush.msrb.mxu3 %v511_v52 }
  0xa9   :  { %330 = vmatpush.msrb.mxu2 %v508_v53 }
  0xaa   :  { %371 = vmatpush.msrb.mxu3 %v509_v54  ;;  %v145_v7 = vpop.f32.mrf.mxu0 }
  0xab   :  { %v186_v10 = vpop.f32.mrf.mxu1 }
  0xac   :  { %v187_v16 = vadd.f32 %v186_v10, %v797_v62 }
  0xae   :  { %501 = vmatmul.msk.f32.gmra.mxu2 %vm223_vm1, %v733_v56 }
  0xaf   :  { %505 = vmatmul.msk.f32.gmra.mxu3 %vm223_vm1, %v733_v56 }
  0xb2   :  { %v148_v21 = vpop.f32.mrf.mxu0 }
  0xb3   :  { %v189_v24 = vpop.f32.mrf.mxu1  ;;  %v149_v31 = vadd.f32 %v148_v21, %v799_v1 }
  0xb4   :  { %v190_v32 = vadd.f32 %v189_v24, %v799_v1 }
  0xb6   :  { %502 = vmatmul.msk.f32.gmra.mxu2 %vm223_vm1, %v745_v58 }
  0xb7   :  { %506 = vmatmul.msk.f32.gmra.mxu3 %vm223_vm1, %v745_v58 }
  0xba   :  { %v151_v38 = vpop.f32.mrf.mxu0 }
  0xbb   :  { %v192_v39 = vpop.f32.mrf.mxu1  ;;  %v152_v43 = vadd.f32 %v151_v38, %v807_v13 }
  0xbc   :  { %v193_v44 = vadd.f32 %v192_v39, %v807_v13 }
  0xbe   :  { %503 = vmatmul.msk.f32.gmra.mxu2 %vm223_vm1, %v754_v59 }
  0xbf   :  { %507 = vmatmul.msk.f32.gmra.mxu3 %vm223_vm1, %v754_v59 }
  0xc6   :  { %512 = vmatmul.msk.f32.vlgmr.msrb.gmra.mxu2 %vm88_vm0, %v594_v5 }
  0xc7   :  { %520 = vmatmul.msk.f32.vlgmr.msrb.gmra.mxu3 %vm88_vm0, %v594_v5 }
  0xce   :  { %513 = vmatmul.msk.f32.gmra.mxu2 %vm88_vm0, %v612_v9 }
  0xcf   :  { %521 = vmatmul.msk.f32.gmra.mxu3 %vm88_vm0, %v612_v9 }
  0xd6   :  { %514 = vmatmul.msk.f32.gmra.mxu2 %vm88_vm0, %v627_v12 }
  0xd7   :  { %522 = vmatmul.msk.f32.gmra.mxu3 %vm88_vm0, %v627_v12 }
  0xde   :  { %515 = vmatmul.msk.f32.gmra.mxu2 %vm88_vm0, %v642_v15 }
  0xdf   :  { %523 = vmatmul.msk.f32.gmra.mxu3 %vm88_vm0, %v642_v15  ;;  %v146_v15 = vadd.f32 %v145_v7, %v797_v62 }
  0xe6   :  { %516 = vmatmul.msk.f32.gmra.mxu2 %vm88_vm0, %v654_v17 }
  0xe7   :  { %524 = vmatmul.msk.f32.gmra.mxu3 %vm88_vm0, %v654_v17 }
  0xee   :  { %517 = vmatmul.msk.f32.gmra.mxu2 %vm88_vm0, %v663_v18 }
  0xef   :  { %525 = vmatmul.msk.f32.gmra.mxu3 %vm88_vm0, %v663_v18 }
  0xf6   :  { %518 = vmatmul.msk.f32.gmra.mxu2 %vm88_vm0, %v672_v19 }
  0xf7   :  { %526 = vmatmul.msk.f32.gmra.mxu3 %vm88_vm0, %v672_v19 }
  0xfe   :  { %519 = vmatmul.msk.f32.gmra.mxu2 %vm88_vm0, %v681_v20 }
  0xff   :  { %527 = vmatmul.msk.f32.gmra.mxu3 %vm88_vm0, %v681_v20 }
 0x129   :  { %v253_v5 = vpop.f32.mrf.mxu2 }
 0x12a   :  { %v282_v6 = vpop.f32.mrf.mxu3  ;;  %v254_v8 = vadd.f32 %v253_v5, %v801_v2 }
 0x12b   :  { %v283_v9 = vadd.f32 %v282_v6, %v801_v2 }
 0x12c   :  { %v294_v11 = vadd.f32 %v254_v8, %v143_v3 }
 0x12d   :  { %v295_v12 = vadd.f32 %v283_v9, %v184_v4 }
 0x12e   :  { %302 = vst [vmem:[%s920_s5] sm:$0xff] %v294_v11 }
 0x12f   :  { %303 = vst [vmem:[%s920_s5 + $0x8] sm:$0xff] %v295_v12 }
 0x131   :  { %v256_v17 = vpop.f32.mrf.mxu2 }
 0x132   :  { %v285_v18 = vpop.f32.mrf.mxu3  ;;  %v257_v19 = vadd.f32 %v256_v17, %v815_v14 }
 0x133   :  { %v286_v20 = vadd.f32 %v285_v18, %v815_v14 }
 0x134   :  { %v296_v22 = vadd.f32 %v257_v19, %v146_v15 }
 0x135   :  { %v297_v23 = vadd.f32 %v286_v20, %v187_v16 }
 0x136   :  { %304 = vst [vmem:[%s920_s5 + $0x10] sm:$0xff] %v296_v22 }
 0x137   :  { %305 = vst [vmem:[%s920_s5 + $0x18] sm:$0xff] %v297_v23 }
 0x139   :  { %v259_v28 = vpop.f32.mrf.mxu2 }
 0x13a   :  { %v288_v30 = vpop.f32.mrf.mxu3  ;;  %v260_v33 = vadd.f32 %v259_v28, %v827_v27 }
 0x13b   :  { %v289_v34 = vadd.f32 %v288_v30, %v827_v27 }
 0x13c   :  { %v298_v35 = vadd.f32 %v260_v33, %v149_v31 }
 0x13d   :  { %v299_v37 = vadd.f32 %v289_v34, %v190_v32 }
 0x13e   :  { %306 = vst [vmem:[%s920_s5 + $0x20] sm:$0xff] %v298_v35 }
 0x13f   :  { %307 = vst [vmem:[%s920_s5 + $0x28] sm:$0xff] %v299_v37 }
 0x141   :  { %v262_v41 = vpop.f32.mrf.mxu2 }
 0x142   :  { %v291_v42 = vpop.f32.mrf.mxu3  ;;  %v263_v45 = vadd.f32 %v262_v41, %v839_v40 }
 0x143   :  { %v292_v46 = vadd.f32 %v291_v42, %v839_v40 }
 0x144   :  { %v300_v47 = vadd.f32 %v263_v45, %v152_v43 }
 0x145   :  { %v301_v48 = vadd.f32 %v292_v46, %v193_v44 }
 0x146   :  { %308 = vst [vmem:[%s920_s5 + $0x30] sm:$0xff] %v300_v47 }
 0x147   :  { %309 = vst [vmem:[%s920_s5 + $0x38] sm:$0xff] %v301_v48 }
 0x149   :  { %v332_v49 = vpop.f32.mrf.mxu2 }
 0x14a   :  { %v373_v51 = vpop.f32.mrf.mxu3  ;;  %v333_v9 = vadd.f32 %v332_v49, %v697_v36 }
 0x14b   :  { %v374_v10 = vadd.f32 %v373_v51, %v697_v36 }
 0x14c   :  { %v397_v16 = vmax.f32 %v333_v9, 0.0 }
 0x151   :  { %v335_v52 = vpop.f32.mrf.mxu2 }
 0x152   :  { %v376_v53 = vpop.f32.mrf.mxu3  ;;  %v336_v5 = vadd.f32 %v335_v52, %v689_v26 }
 0x153   :  { %v377_v6 = vadd.f32 %v376_v53, %v689_v26 }
 0x154   :  { %v399_v15 = vmax.f32 %v336_v5, 0.0 }
 0x159   :  { %v338_v54 = vpop.f32.mrf.mxu2 }
 0x15a   :  { %v379_v55 = vpop.f32.mrf.mxu3  ;;  %v339_v63 = vadd.f32 %v338_v54, %v691_v29 }
 0x15b   :  { %v380_v0 = vadd.f32 %v379_v55, %v691_v29  ;;  %v400_v29 = vmax.f32 %v377_v6, 0.0 }
 0x15c   :  { %v401_v11 = vmax.f32 %v339_v63, 0.0 }
 0x15d   :  { %v402_v12 = vmax.f32 %v380_v0, 0.0 }
 0x161   :  { %v341_v57 = vpop.f32.mrf.mxu2 }
 0x162   :  { %v382_v60 = vpop.f32.mrf.mxu3  ;;  %v342_v3 = vadd.f32 %v341_v57, %v687_v25 }
 0x163   :  { %v383_v4 = vadd.f32 %v382_v60, %v687_v25  ;;  %v398_v25 = vmax.f32 %v374_v10, 0.0 }
 0x164   :  { %v403_v7 = vmax.f32 %v342_v3, 0.0 }
 0x165   :  { %v404_v8 = vmax.f32 %v383_v4, 0.0 }
 0x166   :  { %417 = vmatpush.msrb.mxu0 %v403_v7 }
 0x167   :  { %446 = vmatpush.msrb.mxu1 %v404_v8 }
 0x168   :  { %418 = vmatpush.msrb.mxu0 %v401_v11 }
 0x169   :  { %447 = vmatpush.msrb.mxu1 %v402_v12  ;;  %v344_v26 = vpop.f32.mrf.mxu2 }
 0x16a   :  { %419 = vmatpush.msrb.mxu0 %v399_v15  ;;  %v385_v36 = vpop.f32.mrf.mxu3 }
 0x16b   :  { %448 = vmatpush.msrb.mxu1 %v400_v29  ;;  %v386_v17 = vadd.f32 %v385_v36, %v795_v61 }
 0x16c   :  { %420 = vmatpush.msrb.mxu0 %v397_v16 }
 0x16d   :  { %449 = vmatpush.msrb.mxu1 %v398_v25  ;;  %528 = vmatmul.msk.f32.vlgmr.msrb.gmra.mxu0 %vm223_vm1, %v709_v50 }
 0x16e   :  { %532 = vmatmul.msk.f32.vlgmr.msrb.gmra.mxu1 %vm223_vm1, %v709_v50  ;;  %v345_v50 = vadd.f32 %v344_v26, %v795_v61 }
 0x171   :  { %v347_v21 = vpop.f32.mrf.mxu2 }
 0x172   :  { %v348_v24 = vadd.f32 %v347_v21, %v797_v62 }
 0x175   :  { %529 = vmatmul.msk.f32.gmra.mxu0 %vm223_vm1, %v733_v56 }
 0x176   :  { %533 = vmatmul.msk.f32.gmra.mxu1 %vm223_vm1, %v733_v56 }
 0x179   :  { %v350_v33 = vpop.f32.mrf.mxu2 }
 0x17d   :  { %530 = vmatmul.msk.f32.gmra.mxu0 %vm223_vm1, %v745_v58 }
 0x17e   :  { %534 = vmatmul.msk.f32.gmra.mxu1 %vm223_vm1, %v745_v58  ;;  %v388_v58 = vpop.f32.mrf.mxu3 }
 0x17f   :  { %v389_v28 = vadd.f32 %v388_v58, %v797_v62  ;;  %v351_v62 = vadd.f32 %v350_v33, %v799_v1 }
 0x181   :  { %v353_v43 = vpop.f32.mrf.mxu2 }
 0x185   :  { %531 = vmatmul.msk.f32.gmra.mxu0 %vm223_vm1, %v754_v59 }
 0x186   :  { %535 = vmatmul.msk.f32.gmra.mxu1 %vm223_vm1, %v754_v59  ;;  %v391_v34 = vpop.f32.mrf.mxu3 }
 0x187   :  { %v392_v38 = vadd.f32 %v391_v34, %v799_v1  ;;  %v354_v1 = vadd.f32 %v353_v43, %v807_v13 }
 0x18e   :  { %v394_v44 = vpop.f32.mrf.mxu3 }
 0x18f   :  { %v395_v47 = vadd.f32 %v394_v44, %v807_v13 }
 0x1ea   :  { %v422_v18 = vpop.f32.mrf.mxu0 }
 0x1eb   :  { %v451_v56 = vpop.f32.mrf.mxu1  ;;  %v423_v19 = vadd.f32 %v422_v18, %v801_v2 }
 0x1ec   :  { %v452_v20 = vadd.f32 %v451_v56, %v801_v2 }
 0x1ed   :  { %v463_v22 = vadd.f32 %v423_v19, %v345_v50 }
 0x1ee   :  { %v464_v23 = vadd.f32 %v452_v20, %v386_v17 }
 0x1ef   :  { %536 = vst [vmem:[%s920_s5 + $0x40] sm:$0xff] %v463_v22 }
 0x1f0   :  { %537 = vst [vmem:[%s920_s5 + $0x48] sm:$0xff] %v464_v23 }
 0x1f2   :  { %v425_v59 = vpop.f32.mrf.mxu0 }
 0x1f3   :  { %v454_v61 = vpop.f32.mrf.mxu1  ;;  %v426_v2 = vadd.f32 %v425_v59, %v815_v14 }
 0x1f4   :  { %v455_v30 = vadd.f32 %v454_v61, %v815_v14 }
 0x1f5   :  { %v465_v31 = vadd.f32 %v426_v2, %v348_v24 }
 0x1f6   :  { %v466_v32 = vadd.f32 %v455_v30, %v389_v28 }
 0x1f7   :  { %538 = vst [vmem:[%s920_s5 + $0x50] sm:$0xff] %v465_v31 }
 0x1f8   :  { %539 = vst [vmem:[%s920_s5 + $0x58] sm:$0xff] %v466_v32 }
 0x1fa   :  { %v428_v35 = vpop.f32.mrf.mxu0 }
 0x1fb   :  { %v457_v37 = vpop.f32.mrf.mxu1  ;;  %v429_v14 = vadd.f32 %v428_v35, %v827_v27 }
 0x1fc   :  { %v458_v39 = vadd.f32 %v457_v37, %v827_v27 }
 0x1fd   :  { %v467_v41 = vadd.f32 %v429_v14, %v351_v62 }
 0x1fe   :  { %v468_v42 = vadd.f32 %v458_v39, %v392_v38 }
 0x1ff   :  { %540 = vst [vmem:[%s920_s5 + $0x60] sm:$0xff] %v467_v41 }
 0x200   :  { %541 = vst [vmem:[%s920_s5 + $0x68] sm:$0xff] %v468_v42 }
 0x202   :  { %v431_v45 = vpop.f32.mrf.mxu0 }
 0x203   :  { %v460_v46 = vpop.f32.mrf.mxu1  ;;  %v432_v27 = vadd.f32 %v431_v45, %v839_v40 }
 0x204   :  { %v461_v48 = vadd.f32 %v460_v46, %v839_v40 }
 0x205   :  { %v469_v49 = vadd.f32 %v432_v27, %v354_v1 }
 0x206   :  { %v470_v51 = vadd.f32 %v461_v48, %v395_v47 }
 0x207   :  { %542 = vst [vmem:[%s920_s5 + $0x70] sm:$0xff] %v469_v49 }
 0x208   :  { %543 = vst [vmem:[%s920_s5 + $0x78] sm:$0xff] %v470_v51 }

</bundles_post_ra>
